<compile_context>
chip_gen: v7x
topology: tpu7x:2x2x1
jax: 0.10.0
libtpu: 0.0.40
codegen_flags: <defaults>
</compile_context>

<pallas_src>
import functools

import jax
import jax.numpy as jnp
import numpy as np
from jax.experimental import pallas as pl
from jax.experimental.pallas import tpu as pltpu

# ---- module config (conv_cfg = (in_ch, out_ch, kernel, stride, padding), bias=False) ----
IN_CH, OUT_CH = 4, 8
KH, KW = 3, 3
SH, SW = 2, 2
PH, PW = 1, 1
LEAKY_SLOPE = 0.1
BN_EPS = 1e-5

_VMEM_LIMIT = 32 * 1024 * 1024   # safe scoped limit on v5e/v6e/v7x
_TM_CONV_TARGET = 1024           # conv/matmul pass M-tile target (review: raise above 512)
_TS_APPLY_TARGET = 4096          # bn_apply M-tile target (review: 2048-4096)
_TK_SINGLE_MAX = 2048            # single K tile whenever 2*Cin*KH*KW fits (always for this module)
_STAT_CHUNK = 512                # lane-chunk size for BN statistic reductions (bounds vregs)
ACT_BF16 = False                 # opt-in: bf16 activations/weights (halves dominant HBM reads);
                                 # needs the 1e-4 assert loosened, so default off.


# ----------------------------- helpers -----------------------------
def _round_up(x, m):
    return ((x + m - 1) // m) * m


def _largest_tile(total, granule, target):
    # largest multiple of `granule` that divides `total` and is <= target (total % granule == 0)
    units = total // granule
    limit = max(1, min(units, target // granule))
    for d in range(limit, 0, -1):
        if units % d == 0:
            return d * granule
    return granule


def _pick_chunk(tm):
    for c in (_STAT_CHUNK, 256, 128):
        if tm % c == 0:
            return c
    return tm


# ----------------------------- Pallas kernels -----------------------------
def conv_stats_kernel(b_ref, a_ref, y_ref, st_ref, *, cout, nk, tm, chunk):
    # grid = (M_tiles, K_tiles); M is "parallel" (per-tile stat partials), K is the reduction.
    prod = jnp.dot(b_ref[...], a_ref[...], preferred_element_type=jnp.float32)

    if nk == 1:
        # common case: no accumulator init / reload, single store of the fresh value.
        y_ref[...] = prod
    else:
        k = pl.program_id(1)

        @pl.when(k == 0)
        def _():
            y_ref[...] = prod

        @pl.when(k > 0)
        def _():
            # y block index depends only on i -> resident across the K axis (no scratch needed).
            y_ref[...] += prod

    def stats_epilogue():
        # Per-M-tile BN statistic partial sums; chunked lane reductions keep only a few vregs
        # live at a time (review item: avoid spills at large tm).
        zeros = jnp.zeros((cout, 1), jnp.float32)
        sr = si = srr = sii = sri = zeros
        for c in range(tm // chunk):
            lo = c * chunk
            yr = y_ref[0:cout, lo:lo + chunk]
            yi = y_ref[cout:2 * cout, lo:lo + chunk]
            sr = sr + jnp.sum(yr, axis=1, keepdims=True)
            si = si + jnp.sum(yi, axis=1, keepdims=True)
            srr = srr + jnp.sum(yr * yr, axis=1, keepdims=True)
            sii = sii + jnp.sum(yi * yi, axis=1, keepdims=True)
            sri = sri + jnp.sum(yr * yi, axis=1, keepdims=True)
        st_ref[:, 0:1] = sr
        st_ref[:, 1:2] = si
        st_ref[:, 2:3] = srr
        st_ref[:, 3:4] = sii
        st_ref[:, 4:5] = sri
        st_ref[:, 5:8] = jnp.zeros((cout, 3), jnp.float32)

    if nk == 1:
        stats_epilogue()
    else:
        pl.when(pl.program_id(1) == nk - 1)(stats_epilogue)


def complex_conv_with_stats(bt, at, cout, tm, tk):
    c2, k2p = bt.shape
    _, mp = at.shape
    nm, nk = mp // tm, k2p // tk
    chunk = _pick_chunk(tm)
    kern = functools.partial(conv_stats_kernel, cout=cout, nk=nk, tm=tm, chunk=chunk)
    return pl.pallas_call(
        kern,
        out_shape=(
            jax.ShapeDtypeStruct((c2, mp), jnp.float32),       # y = [yr; yi], (2*Cout, Mp)
            jax.ShapeDtypeStruct((nm, cout, 8), jnp.float32),  # per-M-tile stat partials
        ),
        grid_spec=pltpu.PrefetchScalarGridSpec(
            num_scalar_prefetch=0,
            grid=(nm, nk),
            in_specs=[
                pl.BlockSpec((c2, tk), lambda i, k: (0, k)),
                pl.BlockSpec((tk, tm), lambda i, k: (k, i)),
            ],
            out_specs=(
                pl.BlockSpec((c2, tm), lambda i, k: (0, i)),
                pl.BlockSpec((None, cout, 8), lambda i, k: (i, 0, 0)),
            ),
        ),
        compiler_params=pltpu.CompilerParams(
            dimension_semantics=("parallel", "arbitrary"),
            vmem_limit_bytes=_VMEM_LIMIT,
        ),
    )(bt, at)


def bn_apply_kernel(y_ref, p_ref, or_ref, oi_ref, *, cout, slope):
    # Fused (whitening + affine folded into 4 coeffs + effective bias) + complex leaky-relu.
    yr = y_ref[0:cout, :]
    yi = y_ref[cout:2 * cout, :]
    zrr = p_ref[:, 0:1]
    zri = p_ref[:, 1:2]
    zir = p_ref[:, 2:3]
    zii = p_ref[:, 3:4]
    br = p_ref[:, 4:5]
    bi = p_ref[:, 5:6]
    outr = zrr * yr + zri * yi + br
    outi = zir * yr + zii * yi + bi
    or_ref[...] = jnp.where(outr >= 0.0, outr, slope * outr)
    oi_ref[...] = jnp.where(outi >= 0.0, outi, slope * outi)


def bn_apply(y, params, n, cout, s_pad, ts):
    # Writes (N, Cout, S_pad) blocks directly -> no batch/channel transpose in the wrapper.
    c2, _ = y.shape
    spb = s_pad // ts   # spatial tiles per batch
    kern = functools.partial(bn_apply_kernel, cout=cout, slope=LEAKY_SLOPE)
    return pl.pallas_call(
        kern,
        out_shape=(
            jax.ShapeDtypeStruct((n, cout, s_pad), jnp.float32),
            jax.ShapeDtypeStruct((n, cout, s_pad), jnp.float32),
        ),
        grid_spec=pltpu.PrefetchScalarGridSpec(
            num_scalar_prefetch=0,
            grid=(n, spb),
            in_specs=[
                pl.BlockSpec((c2, ts), lambda b, s: (0, b * spb + s)),
                pl.BlockSpec((cout, 8), lambda b, s: (0, 0)),
            ],
            out_specs=(
                pl.BlockSpec((None, cout, ts), lambda b, s: (b, 0, s)),
                pl.BlockSpec((None, cout, ts), lambda b, s: (b, 0, s)),
            ),
        ),
        compiler_params=pltpu.CompilerParams(
            dimension_semantics=("parallel", "parallel"),
            vmem_limit_bytes=_VMEM_LIMIT,
        ),
    )(y, params)


# ----------------------------- glue (plain JAX) -----------------------------
def im2col_batched(x, kh, kw, sh, sw, ph, pw):
    # (N, C, H, W) -> (C*kh*kw, N, OH*OW): K rows (channel outer, kernel pos inner),
    # per-batch spatial on the trailing (lane) axis.
    N, C, H, W = x.shape
    xp = jnp.pad(x, ((0, 0), (0, 0), (ph, ph), (pw, pw)))
    OH = (H + 2 * ph - kh) // sh + 1
    OW = (W + 2 * pw - kw) // sw + 1
    cols = []
    for i in range(kh):
        for j in range(kw):
            cols.append(xp[:, :, i:i + sh * OH:sh, j:j + sw * OW:sw])
    col = jnp.stack(cols, axis=2)                      # (N, C, KH*KW, OH, OW)
    col = col.transpose(1, 2, 0, 3, 4).reshape(C * kh * kw, N, OH * OW)
    return col, OH, OW


def encoder_forward(xr, xi, wr, wi, bn_params):
    N, Cin, H, W = xr.shape
    Cout = wr.shape[0]
    K = Cin * KH * KW
    K2 = 2 * K

    # ---- patch matrix: one im2col over channel-stacked [real; imag] (no big separate concat) ----
    # TODO(synk): replace the host-side im2col (9x patch duplication in HBM) with an in-kernel
    # gather of the KH*KW shifted sub-matmuls from a phase-split (space-to-depth) input; stride=2
    # with kernel=3 needs overlapping manual-DMA row windows, left for a follow-up.
    xcat = jnp.concatenate([xr, xi], axis=1)                      # (N, 2*Cin, H, W)
    col, OH, OW = im2col_batched(xcat, KH, KW, SH, SW, PH, PW)    # (K2, N, S)
    S = OH * OW
    S_pad = _round_up(S, 128)   # per-batch stripe pad -> bn_apply can emit (N, Cout, S_pad) directly
    if S_pad != S:
        col = jnp.pad(col, ((0, 0), (0, 0), (0, S_pad - S)))      # zero cols are inert (no bias)
    Mp = N * S_pad
    at = col.reshape(K2, Mp)

    wr2 = wr.reshape(Cout, K)
    wi2 = wi.reshape(Cout, K)
    bt = jnp.concatenate(
        [jnp.concatenate([wr2, -wi2], axis=1),
         jnp.concatenate([wi2, wr2], axis=1)], axis=0)            # (2*Cout, K2)

    # ---- K padding / tile selection (padding kept to <= one granule; tiles divide exactly) ----
    if K2 <= _TK_SINGLE_MAX:
        K2p = _round_up(K2, 8)
        tk = K2p
    else:
        K2p = _round_up(K2, 512)
        tk = 512
    if K2p != K2:
        at = jnp.pad(at, ((0, K2p - K2), (0, 0)))
        bt = jnp.pad(bt, ((0, 0), (0, K2p - K2)))
    tm = _largest_tile(Mp, 128, _TM_CONV_TARGET)

    if ACT_BF16:
        at = at.astype(jnp.bfloat16)
        bt = bt.astype(jnp.bfloat16)

    y, stat_tiles = complex_conv_with_stats(bt, at, Cout, tm, tk)

    # ---- fold complex BN whitening + affine into 4 coeffs + effective bias (tiny, plain JAX) ----
    stats = stat_tiles.sum(axis=0)                                # reduce per-tile partials
    inv_m = 1.0 / float(N * S)
    sr, si = stats[:, 0], stats[:, 1]
    srr, sii, sri = stats[:, 2], stats[:, 3], stats[:, 4]
    mr, mi = sr * inv_m, si * inv_m
    # NOTE: one-pass E[x^2]-mean^2 variance; f32 per-tile partials keep it accurate here, a
    # centered second pass would be more robust for very large M.
    vrr = srr * inv_m - mr * mr + BN_EPS
    vii = sii * inv_m - mi * mi + BN_EPS
    vri = sri * inv_m - mr * mi
    tau = vrr + vii
    delta = vrr * vii - vri * vri
    s = jnp.sqrt(delta)
    t = jnp.sqrt(tau + 2.0 * s)
    rst = 1.0 / (s * t)
    urr = (s + vii) * rst
    uii = (s + vrr) * rst
    uri = -vri * rst

    wrr, wri, wii = bn_params[0], bn_params[1], bn_params[2]
    br, bi = bn_params[3], bn_params[4]
    zrr = wrr * urr + wri * uri
    zri = wrr * uri + wri * uii
    zir = wri * urr + wii * uri
    zii = wri * uri + wii * uii
    br_eff = br - (zrr * mr + zri * mi)
    bi_eff = bi - (zir * mr + zii * mi)

    zero = jnp.zeros_like(zrr)
    papply = jnp.stack([zrr, zri, zir, zii, br_eff, bi_eff, zero, zero], axis=1)  # (Cout, 8)

    ts = _largest_tile(S_pad, 128, _TS_APPLY_TARGET)
    outr, outi = bn_apply(y, papply, N, Cout, S_pad, ts)

    # (N, Cout, S_pad) -> NCHW: trailing-lane slice (no-op when S_pad == S) + free reshape;
    # no batch/channel transpose round trip.
    zr = outr[:, :, :S].reshape(N, Cout, OH, OW)
    zi = outi[:, :, :S].reshape(N, Cout, OH, OW)
    return zr, zi


# ----------------------------- pure-JAX reference -----------------------------
def ref_forward(xr, xi, wr, wi, bn_params):
    dn = ("NCHW", "OIHW", "NCHW")
    conv = lambda x, w: jax.lax.conv_general_dilated(
        x, w, (SH, SW), [(PH, PH), (PW, PW)], dimension_numbers=dn)
    yr = conv(xr, wr) - conv(xi, wi)
    yi = conv(xi, wr) + conv(xr, wi)

    axes = (0, 2, 3)
    mr = jnp.mean(yr, axis=axes, keepdims=True)
    mi = jnp.mean(yi, axis=axes, keepdims=True)
    cr, ci = yr - mr, yi - mi
    vrr = jnp.mean(cr * cr, axis=axes, keepdims=True) + BN_EPS
    vii = jnp.mean(ci * ci, axis=axes, keepdims=True) + BN_EPS
    vri = jnp.mean(cr * ci, axis=axes, keepdims=True)
    tau = vrr + vii
    delta = vrr * vii - vri * vri
    s = jnp.sqrt(delta)
    t = jnp.sqrt(tau + 2.0 * s)
    rst = 1.0 / (s * t)
    urr, uii, uri = (s + vii) * rst, (s + vrr) * rst, -vri * rst

    v = lambda r: bn_params[r].reshape(1, -1, 1, 1)
    wrr, wri, wii, br, bi = v(0), v(1), v(2), v(3), v(4)
    zrr = wrr * urr + wri * uri
    zri = wrr * uri + wri * uii
    zir = wri * urr + wii * uri
    zii = wri * uri + wii * uii
    yr = zrr * cr + zri * ci + br
    yi = zir * cr + zii * ci + bi
    lr = lambda x: jnp.where(x >= 0.0, x, LEAKY_SLOPE * x)
    return lr(yr), lr(yi)


# ----------------------------- main -----------------------------
if __name__ == "__main__":
    key = jax.random.PRNGKey(0)
    k_xr, k_xi, k_wr, k_wi = jax.random.split(key, 4)

    N, H, W = 2, 16, 16
    xr = jax.random.normal(k_xr, (N, IN_CH, H, W), dtype=jnp.float32)
    xi = jax.random.normal(k_xi, (N, IN_CH, H, W), dtype=jnp.float32)

    # conv weights (bias=False), PyTorch OIHW layout, deterministic init
    wr = 0.1 * jax.random.normal(k_wr, (OUT_CH, IN_CH, KH, KW), dtype=jnp.float32)
    wi = 0.1 * jax.random.normal(k_wi, (OUT_CH, IN_CH, KH, KW), dtype=jnp.float32)

    # ComplexBatchNorm params: rows = [Wrr, Wri, Wii, Br, Bi, pad, pad, pad]
    bn_params = jnp.zeros((8, OUT_CH), jnp.float32)
    bn_params = bn_params.at[0].set(1.0)    # Wrr
    bn_params = bn_params.at[1].set(0.1)    # Wri (non-trivial, exercises cross terms)
    bn_params = bn_params.at[2].set(1.0)    # Wii
    bn_params = bn_params.at[3].set(0.01)   # Br
    bn_params = bn_params.at[4].set(-0.01)  # Bi
    # TODO(synk): running-mean/covariance buffers + momentum update (track_running_stats) are
    # stateful and omitted; this kernel implements training-mode batch statistics.

    zr, zi = encoder_forward(xr, xi, wr, wi, bn_params)
    jax.block_until_ready((zr, zi))

    rr, ri = ref_forward(xr, xi, wr, wi, bn_params)
    np.testing.assert_allclose(np.asarray(zr), np.asarray(rr), rtol=1e-4, atol=1e-4)
    np.testing.assert_allclose(np.asarray(zi), np.asarray(ri), rtol=1e-4, atol=1e-4)

    print("KERNEL_OK")
</pallas_src>

<mosaic_0001>
module attributes {stable_mosaic.version = 11 : i64} {
  func.func @conv_stats_kernel(%arg0: i32, %arg1: i32, %arg2: memref<16x72xf32, #tpu.memory_space<vmem>>, %arg3: memref<72x256xf32, #tpu.memory_space<vmem>>, %arg4: memref<16x256xf32, #tpu.memory_space<vmem>>, %arg5: memref<1x8x8xf32, #tpu.memory_space<vmem>>) attributes {dimension_semantics = [#tpu.dimension_semantics<parallel>, #tpu.dimension_semantics<arbitrary>], iteration_bounds = array<i64: 1, 1>, scalar_prefetch = 0 : i64, scratch_operands = 0 : i64, tpu.core_type = #tpu.core_type<tc>, window_params = [{transform_indices = @transform_0, window_bounds = array<i64: 16, 72>}, {transform_indices = @transform_1, window_bounds = array<i64: 72, 256>}, {transform_indices = @transform_2, window_bounds = array<i64: 16, 256>}, {transform_indices = @transform_3, window_bounds = array<i64: 1, 8, 8>}]} {
    %c0 = arith.constant 0 : index
    %c0_0 = arith.constant 0 : index
    %0 = vector.load %arg2[%c0, %c0_0] : memref<16x72xf32, #tpu.memory_space<vmem>>, vector<16x72xf32>
    %c0_1 = arith.constant 0 : index
    %c0_2 = arith.constant 0 : index
    %1 = vector.load %arg3[%c0_1, %c0_2] : memref<72x256xf32, #tpu.memory_space<vmem>>, vector<72x256xf32>
    %cst = arith.constant dense<0.000000e+00> : vector<16x256xf32>
    %2 = tpu.matmul %0, %1, %cst {dimension_numbers = #tpu.dot_dimension_numbers<[1], [0], [0], [1], [0, 0, 1, 1], [], []>} : vector<16x72xf32>, vector<72x256xf32>, vector<16x256xf32> -> vector<16x256xf32>
    %c0_3 = arith.constant 0 : index
    %c0_4 = arith.constant 0 : index
    %3 = vector.load %arg4[%c0_3, %c0_4] : memref<16x256xf32, #tpu.memory_space<vmem>>, vector<16x256xf32>
    tpu.vector_store %arg4[%c0_3, %c0_4], %2 {strides = array<i32>} : memref<16x256xf32, #tpu.memory_space<vmem>>, vector<16x256xf32>,
    %cst_5 = arith.constant 0.000000e+00 : f32
    %4 = vector.broadcast %cst_5 : f32 to vector<8x1xf32>
    %c0_6 = arith.constant 0 : index
    %c0_7 = arith.constant 0 : index
    %5 = vector.load %arg4[%c0_6, %c0_7] : memref<16x256xf32, #tpu.memory_space<vmem>>, vector<8x256xf32>
    %c8 = arith.constant 8 : index
    %c0_8 = arith.constant 0 : index
    %6 = vector.load %arg4[%c8, %c0_8] : memref<16x256xf32, #tpu.memory_space<vmem>>, vector<8x256xf32>
    %cst_9 = arith.constant dense<0.000000e+00> : vector<8xf32>
    %7 = vector.multi_reduction <add>, %5, %cst_9 [1] : vector<8x256xf32> to vector<8xf32>
    %8 = vector.shape_cast %7 : vector<8xf32> to vector<8x1xf32>
    %9 = arith.addf %4, %8 : vector<8x1xf32>
    %cst_10 = arith.constant dense<0.000000e+00> : vector<8xf32>
    %10 = vector.multi_reduction <add>, %6, %cst_10 [1] : vector<8x256xf32> to vector<8xf32>
    %11 = vector.shape_cast %10 : vector<8xf32> to vector<8x1xf32>
    %12 = arith.addf %4, %11 : vector<8x1xf32>
    %13 = arith.mulf %5, %5 : vector<8x256xf32>
    %cst_11 = arith.constant dense<0.000000e+00> : vector<8xf32>
    %14 = vector.multi_reduction <add>, %13, %cst_11 [1] : vector<8x256xf32> to vector<8xf32>
    %15 = vector.shape_cast %14 : vector<8xf32> to vector<8x1xf32>
    %16 = arith.addf %4, %15 : vector<8x1xf32>
    %17 = arith.mulf %6, %6 : vector<8x256xf32>
    %cst_12 = arith.constant dense<0.000000e+00> : vector<8xf32>
    %18 = vector.multi_reduction <add>, %17, %cst_12 [1] : vector<8x256xf32> to vector<8xf32>
    %19 = vector.shape_cast %18 : vector<8xf32> to vector<8x1xf32>
    %20 = arith.addf %4, %19 : vector<8x1xf32>
    %21 = arith.mulf %5, %6 : vector<8x256xf32>
    %cst_13 = arith.constant dense<0.000000e+00> : vector<8xf32>
    %22 = vector.multi_reduction <add>, %21, %cst_13 [1] : vector<8x256xf32> to vector<8xf32>
    %23 = vector.shape_cast %22 : vector<8xf32> to vector<8x1xf32>
    %24 = arith.addf %4, %23 : vector<8x1xf32>
    %c0_14 = arith.constant 0 : index
    %c0_15 = arith.constant 0 : index
    %c0_16 = arith.constant 0 : index
    %25 = vector.load %arg5[%c0_14, %c0_15, %c0_16] : memref<1x8x8xf32, #tpu.memory_space<vmem>>, vector<1x8x1xf32>
    %26 = vector.shape_cast %25 : vector<1x8x1xf32> to vector<8x1xf32>
    %27 = vector.shape_cast %9 : vector<8x1xf32> to vector<1x8x1xf32>
    tpu.vector_store %arg5[%c0_14, %c0_15, %c0_16], %27 {strides = array<i32>} : memref<1x8x8xf32, #tpu.memory_space<vmem>>, vector<1x8x1xf32>,
    %c0_17 = arith.constant 0 : index
    %c0_18 = arith.constant 0 : index
    %c1 = arith.constant 1 : index
    %28 = vector.load %arg5[%c0_17, %c0_18, %c1] : memref<1x8x8xf32, #tpu.memory_space<vmem>>, vector<1x8x1xf32>
    %29 = vector.shape_cast %28 : vector<1x8x1xf32> to vector<8x1xf32>
    %30 = vector.shape_cast %12 : vector<8x1xf32> to vector<1x8x1xf32>
    tpu.vector_store %arg5[%c0_17, %c0_18, %c1], %30 {strides = array<i32>} : memref<1x8x8xf32, #tpu.memory_space<vmem>>, vector<1x8x1xf32>,
    %c0_19 = arith.constant 0 : index
    %c0_20 = arith.constant 0 : index
    %c2 = arith.constant 2 : index
    %31 = vector.load %arg5[%c0_19, %c0_20, %c2] : memref<1x8x8xf32, #tpu.memory_space<vmem>>, vector<1x8x1xf32>
    %32 = vector.shape_cast %31 : vector<1x8x1xf32> to vector<8x1xf32>
    %33 = vector.shape_cast %16 : vector<8x1xf32> to vector<1x8x1xf32>
    tpu.vector_store %arg5[%c0_19, %c0_20, %c2], %33 {strides = array<i32>} : memref<1x8x8xf32, #tpu.memory_space<vmem>>, vector<1x8x1xf32>,
    %c0_21 = arith.constant 0 : index
    %c0_22 = arith.constant 0 : index
    %c3 = arith.constant 3 : index
    %34 = vector.load %arg5[%c0_21, %c0_22, %c3] : memref<1x8x8xf32, #tpu.memory_space<vmem>>, vector<1x8x1xf32>
    %35 = vector.shape_cast %34 : vector<1x8x1xf32> to vector<8x1xf32>
    %36 = vector.shape_cast %20 : vector<8x1xf32> to vector<1x8x1xf32>
    tpu.vector_store %arg5[%c0_21, %c0_22, %c3], %36 {strides = array<i32>} : memref<1x8x8xf32, #tpu.memory_space<vmem>>, vector<1x8x1xf32>,
    %c0_23 = arith.constant 0 : index
    %c0_24 = arith.constant 0 : index
    %c4 = arith.constant 4 : index
    %37 = vector.load %arg5[%c0_23, %c0_24, %c4] : memref<1x8x8xf32, #tpu.memory_space<vmem>>, vector<1x8x1xf32>
    %38 = vector.shape_cast %37 : vector<1x8x1xf32> to vector<8x1xf32>
    %39 = vector.shape_cast %24 : vector<8x1xf32> to vector<1x8x1xf32>
    tpu.vector_store %arg5[%c0_23, %c0_24, %c4], %39 {strides = array<i32>} : memref<1x8x8xf32, #tpu.memory_space<vmem>>, vector<1x8x1xf32>,
    %cst_25 = arith.constant 0.000000e+00 : f32
    %40 = vector.broadcast %cst_25 : f32 to vector<8x3xf32>
    %c0_26 = arith.constant 0 : index
    %c0_27 = arith.constant 0 : index
    %c5 = arith.constant 5 : index
    %41 = vector.load %arg5[%c0_26, %c0_27, %c5] : memref<1x8x8xf32, #tpu.memory_space<vmem>>, vector<1x8x3xf32>
    %42 = vector.shape_cast %41 : vector<1x8x3xf32> to vector<8x3xf32>
    %43 = vector.shape_cast %40 : vector<8x3xf32> to vector<1x8x3xf32>
    tpu.vector_store %arg5[%c0_26, %c0_27, %c5], %43 {strides = array<i32>} : memref<1x8x8xf32, #tpu.memory_space<vmem>>, vector<1x8x3xf32>,
    return
  }
  func.func @transform_0(%arg0: i32, %arg1: i32) -> (i32, i32) {
    %c0_i32 = arith.constant 0 : i32
    %c0_i32_0 = arith.constant 0 : i32
    return %c0_i32, %arg1 : i32, i32
  }
  func.func @transform_1(%arg0: i32, %arg1: i32) -> (i32, i32) {
    %c0_i32 = arith.constant 0 : i32
    return %arg1, %arg0 : i32, i32
  }
  func.func @transform_2(%arg0: i32, %arg1: i32) -> (i32, i32) {
    %c0_i32 = arith.constant 0 : i32
    %c0_i32_0 = arith.constant 0 : i32
    return %c0_i32, %arg0 : i32, i32
  }
  func.func @transform_3(%arg0: i32, %arg1: i32) -> (i32, i32, i32) {
    %c0_i32 = arith.constant 0 : i32
    %c0_i32_0 = arith.constant 0 : i32
    %c0_i32_1 = arith.constant 0 : i32
    return %arg0, %c0_i32, %c0_i32_0 : i32, i32, i32
  }
}

</mosaic_0001>

<bundles_post_ra>
// kernel: tpu_custom_call.1
= control target key start
LH: loop header
LB: loop body
LE: loop exit
PB: predicated region body
PF: predicated region fallthrough
CT: control target
= control target key end

     0   :  { %9 = vsyncpa [#allocation3], 0  ;;  %s444_s0 = inlined_call_operand.hbm [shape: f32[16,72], index: 0, kind: input, shape index: {}]   ;;  %s445_s1 = inlined_call_operand.hbm [shape: f32[72,256], index: 1, kind: input, shape index: {}]   ;;  %s446_s2 = inlined_call_operand.hbm [shape: f32[16,256], index: 2, kind: output, shape index: {0}]   ;;  %s447_s3 = inlined_call_operand.hbm [shape: f32[1,8,8], index: 3, kind: output, shape index: {1}]  }
   0x1   :  { %10 = vsyncpa [#allocation6], 0 }
   0x2   :  { %11 = vsyncpa [#allocation4], 0 }
   0x3   :  { %12 = vsyncpa [#allocation9], 0  ;;  %s358_s12 = smov [#allocation2]   ;;  %s262_s16 = scalar_lea.hbm %s444_s0, 256 }
   0x4   :  { %s18_s13 = sshll.u32 %s358_s12, 4  ;;  %p263_p0 = scmp.ne.s32.totalorder %s444_s0, %s262_s16  ;;  %s19_s13 = int_to_ptr.vmem [resolvable:$true] %s18_s13 }
   0x5   :  { %p266_p1 = scmp.lt.u32.totalorder %s262_s16, %s444_s0 }
   0x7   :  { %p268_p2 = pnand %p266_p1, %p263_p0 }
   0x9   :  { %271 = shalt.err (!%p268_p2)
}
   0xa   :  { %s272_s21 = scalar_lea.vmem %s19_s13, 256  ;;  %p277_p4 = scmp.lt.s32.totalorder %s19_s13, %s19_s13 }
   0xb   :  { %p273_p3 = scmp.ne.s32.totalorder %s19_s13, %s272_s21  ;;  %p278_p5 = scmp.lt.s32.totalorder %s272_s21, %s272_s21 }
   0xd   :  { %p279_p6 = por %p278_p5, %p277_p4 }
   0xf   :  { %p280_p7 = pnand %p279_p6, %p273_p3 }
  0x11   :  { %283 = shalt.err (!%p280_p7)
}
  0x12   :  { %s359_s22 = smov 128   ;;  %s360_s23 = smov 8  }
  0x13   :  { %24 = dma.hbm_to_vmem [thread:$0]  %s444_s0, 256, %s19_s13, [#allocation3], %s359_s22, %s359_s22, %s360_s23  }
  0x14   :  { %s361_s26 = smov [#allocation5]   ;;  %s284_s30 = scalar_lea.hbm %s445_s1, 2304 }
  0x15   :  { %s30_s27 = sshll.u32 %s361_s26, 4  ;;  %p285_p8 = scmp.ne.s32.totalorder %s445_s1, %s284_s30  ;;  %s31_s27 = int_to_ptr.vmem [resolvable:$true] %s30_s27 }
  0x16   :  { %p288_p9 = scmp.lt.u32.totalorder %s284_s30, %s445_s1 }
  0x18   :  { %p290_p10 = pnand %p288_p9, %p285_p8 }
  0x1a   :  { %293 = shalt.err (!%p290_p10)
}
  0x1b   :  { %s294_s8 = scalar_lea.vmem %s31_s27, 2304  ;;  %p299_p12 = scmp.lt.s32.totalorder %s31_s27, %s31_s27 }
  0x1c   :  { %p295_p11 = scmp.ne.s32.totalorder %s31_s27, %s294_s8  ;;  %p300_p13 = scmp.lt.s32.totalorder %s294_s8, %s294_s8 }
  0x1e   :  { %p301_p0 = por %p300_p13, %p299_p12 }
  0x20   :  { %p302_p1 = pnand %p301_p0, %p295_p11 }
  0x22   :  { %305 = shalt.err (!%p302_p1)
}
  0x23   :  { %s362_s0 = smov 256   ;;  %s363_s9 = smov 16  }
  0x24   :  { %36 = dma.hbm_to_vmem [thread:$0]  %s445_s1, 2304, %s31_s27, [#allocation6], %s362_s0, %s362_s0, %s363_s9  }
  0x25   :  { %350 = dma.done.wait [#allocation3], 256  }
  0x26   :  { %351 = vsyncadd [#allocation3], 4294967040 }
  0x27   :  { %352 = dma.done.wait [#allocation6], 2304  }
  0x28   :  { %353 = vsyncadd [#allocation6], 4294964992  ;;  %v364_v0 = vmov 0.0   ;;  %v46_v1 = vld [vmem:[#allocation5 + $0x8] sm:$0xff]  ;;  %v48_v2 = vld [vmem:[#allocation5 + $0x18] sm:$0xff]  ;;  %vm63_vm0 = vcmask 588800  }
  0x29   :  { %134 = vmatprep.mubr.f32.mxu0 %v364_v0  ;;  %140 = vmatprep.mubr.f32.mxu1 %v364_v0  ;;  %v45_v3 = vld [vmem:[#allocation5] sm:$0xff]  ;;  %v227_v4 = vpack.c.bf16 %v48_v2, %v46_v1  ;;  %v47_v5 = vld [vmem:[#allocation5 + $0x10] sm:$0xff]  ;;  %v50_v6 = vld [vmem:[#allocation5 + $0x28] sm:$0xff]  ;;  %s365_s1 = smov [#allocation7]  }
  0x2a   :  { %v52_v7 = vld [vmem:[#allocation5 + $0x38] sm:$0xff]  ;;  %v229_v8 = vpack.c.bf16 %v47_v5, %v45_v3  ;;  %v49_v10 = vld [vmem:[#allocation5 + $0x20] sm:$0xff]  ;;  %v51_v11 = vld [vmem:[#allocation5 + $0x30] sm:$0xff]  ;;  %s198_s12 = sshll.u32 %s365_s1, 4  ;;  %s199_s12 = int_to_ptr.vmem [resolvable:$true] %s198_s12 }
  0x2b   :  { %v231_v9 = vpack.c.bf16 %v52_v7, %v50_v6  ;;  %v54_v12 = vld [vmem:[#allocation5 + $0x48] sm:$0xff]  ;;  %228 = vmatprep.subr.bf16.mxu0 %v227_v4  ;;  %243 = vmatprep.subr.bf16.mxu1 %v227_v4  ;;  %v56_v13 = vld [vmem:[#allocation5 + $0x58] sm:$0xff]  ;;  %v233_v14 = vpack.c.bf16 %v51_v11, %v49_v10  ;;  %v53_v16 = vld [vmem:[#allocation5 + $0x40] sm:$0xff]  ;;  %s306_s13 = scalar_lea.vmem %s199_s12, 512  ;;  %p311_p3 = scmp.lt.s32.totalorder %s199_s12, %s199_s12 }
  0x2c   :  { %230 = vmatpush1.bf16.msra.mxu0 %v229_v8  ;;  %248 = vmatpush1.bf16.msra.mxu1 %v229_v8  ;;  %v235_v15 = vpack.c.bf16 %v56_v13, %v54_v12  ;;  %v55_v17 = vld [vmem:[#allocation5 + $0x50] sm:$0xff]  ;;  %v58_v18 = vld [vmem:[#allocation5 + $0x68] sm:$0xff]  ;;  %v60_v19 = vld [vmem:[#allocation5 + $0x78] sm:$0xff]  ;;  %p307_p2 = scmp.ne.s32.totalorder %s199_s12, %s306_s13  ;;  %p312_p4 = scmp.lt.s32.totalorder %s306_s13, %s306_s13 }
  0x2d   :  { %232 = vmatprep.subr.bf16.mxu0 %v231_v9  ;;  %244 = vmatprep.subr.bf16.mxu1 %v231_v9  ;;  %v237_v20 = vpack.c.bf16 %v55_v17, %v53_v16  ;;  %v239_v21 = vpack.c.bf16 %v60_v19, %v58_v18  ;;  %v57_v22 = vld [vmem:[#allocation5 + $0x60] sm:$0xff]  ;;  %v59_v23 = vld [vmem:[#allocation5 + $0x70] sm:$0xff]  ;;  %v62_v25 = vld [vmem:[#allocation5 + $0x88] sm:$0xff] }
  0x2e   :  { %v241_v24 = vpack.c.bf16 %v59_v23, %v57_v22  ;;  %v61_v26 = vld [vmem:[#allocation5 + $0x80] sm:$0xff]  ;;  %v43_v27 = vld [vmem:[#allocation2] sm:$0xff]  ;;  %v44_v28 = vld [vmem:[#allocation2 + $0x8] sm:$0xff]  ;;  %p313_p5 = por %p312_p4, %p311_p3 }
  0x30   :  { %234 = vmatpush1.bf16.msra.mxu0 %v233_v14  ;;  %249 = vmatpush1.bf16.msra.mxu1 %v233_v14  ;;  %p314_p6 = pnand %p313_p5, %p307_p2 }
  0x31   :  { %236 = vmatprep.subr.bf16.mxu0 %v235_v15  ;;  %245 = vmatprep.subr.bf16.mxu1 %v235_v15 }
  0x34   :  { %238 = vmatpush1.bf16.msra.mxu0 %v237_v20  ;;  %250 = vmatpush1.bf16.msra.mxu1 %v237_v20 }
  0x35   :  { %240 = vmatprep.subr.bf16.mxu0 %v239_v21  ;;  %246 = vmatprep.subr.bf16.mxu1 %v239_v21 }
  0x38   :  { %242 = vmatpush1.bf16.msra.mxu0 %v241_v24  ;;  %251 = vmatpush1.bf16.msra.mxu1 %v241_v24 }
  0x39   :  { %86 = vmatprep.subr.mxu0 %v62_v25  ;;  %247 = vmatprep.subr.mxu1 %v62_v25 }
  0x3c   :  { %87 = vmatpush1.msra.mxu0 %v61_v26  ;;  %252 = vmatpush1.msra.mxu1 %v61_v26 }
  0x3d   :  { %225 = vmatmul.mubr.msk.f32.vlgmr.msra.gmra.mrb[0].mxu0 %vm63_vm0, %v43_v27  ;;  %226 = vmatmul.mubr.msk.f32.vlgmr.msra.gmra.mrb[0].mxu1 %vm63_vm0, %v44_v28 }
 0x110   :  { %v136_v29 = vpop.f32.mrb[0].mxu0  ;;  %v142_v30 = vpop.f32.mrb[0].mxu1 }
 0x111   :  { %147 = vst [vmem:[#allocation7] sm:$0xff] %v136_v29  ;;  %149 = vst [vmem:[#allocation7 + $0x10] sm:$0xff] %v142_v30  ;;  %v138_v31 = vpop.f32.mrb[1].mxu0  ;;  %v144_v32 = vpop.f32.mrb[1].mxu1  ;;  %v163_v33 = vmul.f32 %v136_v29, %v136_v29  ;;  %v169_v34 = vmul.f32 %v142_v30, %v142_v30  ;;  %v175_v35 = vmul.f32 %v142_v30, %v136_v29 }
 0x112   :  { %148 = vst [vmem:[#allocation7 + $0x8] sm:$0xff] %v138_v31  ;;  %150 = vst [vmem:[#allocation7 + $0x18] sm:$0xff] %v144_v32  ;;  %v155_v36 = vadd.f32 %v138_v31, %v136_v29  ;;  %v164_v37 = vmul.f32 %v138_v31, %v138_v31  ;;  %v159_v38 = vadd.f32 %v144_v32, %v142_v30 }
 0x113   :  { %v170_v39 = vmul.f32 %v144_v32, %v144_v32  ;;  %v176_v40 = vmul.f32 %v144_v32, %v138_v31 }
 0x114   :  { %156 = vadd.xlane.f32.xlu0 %v155_v36  ;;  %v165_v41 = vadd.f32 %v164_v37, %v163_v33 }
 0x115   :  { %v171_v42 = vadd.f32 %v170_v39, %v169_v34  ;;  %v177_v43 = vadd.f32 %v176_v40, %v175_v35 }
 0x116   :  { %166 = vadd.xlane.f32.xlu1 %v165_v41 }
 0x118   :  { %160 = vadd.xlane.f32.xlu0 %v159_v38 }
 0x11a   :  { %172 = vadd.xlane.f32.xlu1 %v171_v42 }
 0x11c   :  { %178 = vadd.xlane.f32.xlu0 %v177_v43 }
 0x11d   :  { %317 = shalt.err (!%p314_p6)
}
 0x11e   :  { %s318_s16 = scalar_lea.hbm %s446_s2, 512 }
 0x11f   :  { %p319_p7 = scmp.ne.s32.totalorder %s446_s2, %s318_s16  ;;  %p322_p8 = scmp.lt.u32.totalorder %s318_s16, %s446_s2 }
 0x121   :  { %p324_p9 = pnand %p322_p8, %p319_p7 }
 0x123   :  { %327 = shalt.err (!%p324_p9)
}
 0x124   :  { %204 = dma.vmem_to_hbm [thread:$0]  %s199_s12, 512, %s446_s2, [#allocation4], %s362_s0, %s362_s0, %s363_s9   ;;  %vm181_vm1 = vcmask 7168   ;;  %vm183_vm2 = vcmask 15368   ;;  %vm185_vm3 = vcmask 23568   ;;  %vm187_vm4 = vcmask 31768  }
 0x125   :  { %s366_s23 = smov [#allocation8]   ;;  %vm189_vm5 = vcmask 39968   ;;  %vm191_vm6 = vcmask 64552  }
 0x126   :  { %s211_s24 = sshll.u32 %s366_s23, 4  ;;  %s212_s24 = int_to_ptr.vmem [resolvable:$true] %s211_s24 }
 0x127   :  { %s328_s2 = scalar_lea.vmem %s212_s24, 128  ;;  %p333_p11 = scmp.lt.s32.totalorder %s212_s24, %s212_s24 }
 0x128   :  { %p329_p10 = scmp.ne.s32.totalorder %s212_s24, %s328_s2  ;;  %p334_p12 = scmp.lt.s32.totalorder %s328_s2, %s328_s2 }
 0x12a   :  { %p335_p13 = por %p334_p12, %p333_p11 }
 0x12c   :  { %p336_p0 = pnand %p335_p13, %p329_p10 }
 0x1a1   :  { %v157_v44 = vpop.xlane.xlu0 %156 }
 0x1a2   :  { %182 = vst.msk [vmem:[#allocation8] sm:$0xff] %vm181_vm1, %v157_v44 }
 0x1a3   :  { %v167_v45 = vpop.xlane.xlu1 %166 }
 0x1a5   :  { %v161_v46 = vpop.xlane.xlu0 %160 }
 0x1a6   :  { %184 = vst.msk [vmem:[#allocation8] sm:$0xff] %vm183_vm2, %v161_v46 }
 0x1a7   :  { %v173_v47 = vpop.xlane.xlu1 %172  ;;  %186 = vst.msk [vmem:[#allocation8] sm:$0xff] %vm185_vm3, %v167_v45 }
 0x1a8   :  { %188 = vst.msk [vmem:[#allocation8] sm:$0xff] %vm187_vm4, %v173_v47 }
 0x1a9   :  { %v179_v48 = vpop.xlane.xlu0 %178 }
 0x1aa   :  { %190 = vst.msk [vmem:[#allocation8] sm:$0xff] %vm189_vm5, %v179_v48 }
 0x1ab   :  { %192 = vst.msk [vmem:[#allocation8] sm:$0xff] %vm191_vm6, %v364_v0 }
 0x1ac   :  { %339 = shalt.err (!%p336_p0)
}
 0x1ad   :  { %s340_s27 = scalar_lea.hbm %s447_s3, 128 }
 0x1ae   :  { %p341_p1 = scmp.ne.s32.totalorder %s447_s3, %s340_s27  ;;  %p344_p2 = scmp.lt.u32.totalorder %s340_s27, %s447_s3 }
 0x1b0   :  { %p346_p3 = pnand %p344_p2, %p341_p1 }
 0x1b2   :  { %349 = shalt.err (!%p346_p3)
}
 0x1b3   :  { %214 = dma.vmem_to_hbm [thread:$0]  %s212_s24, 128, %s447_s3, [#allocation9]  }
 0x1b4   :  { %354 = dma.done.wait [#allocation4], 512  }
 0x1b5   :  { %355 = vsyncadd [#allocation4], 4294966784 }
 0x1b6   :  { %356 = dma.done.wait [#allocation9], 128  }
 0x1b7   :  { %357 = vsyncadd [#allocation9], 4294967168 }
 0x1b8   :  { %221 = vsyncpa [#allocation3], 1 }
 0x1b9   :  { %222 = vsyncpa [#allocation6], 1 }
 0x1ba   :  { %223 = vsyncpa [#allocation4], 1 }
 0x1bb   :  { %224 = vsyncpa [#allocation9], 1 }

</bundles_post_ra>
